<compile_context>
chip_gen: v7x
topology: tpu7x:2x2x1
jax: 0.10.0
libtpu: 0.0.40
codegen_flags: <defaults>
</compile_context>

<pallas_src>
import jax
import jax.numpy as jnp
from jax.experimental import pallas as pl
from jax.experimental.pallas import tpu as pltpu

EPS = 1e-5
HEAD_PAD = 128  # lane-dense padded width for the 2-logit head


def _bn_relu(x, gamma, beta):
    """BatchNorm1d (batch stats, biased var) folded to scale/shift, then ReLU."""
    inv_n = 1.0 / x.shape[0]
    s = jnp.sum(x, axis=0, keepdims=True)
    sq = jnp.sum(x * x, axis=0, keepdims=True)
    mu = s * inv_n
    var = jnp.maximum(sq * inv_n - mu * mu, 0.0)       # E[x^2] - mu^2, clamped
    scale = gamma * jax.lax.rsqrt(var + EPS)
    shift = beta - mu * scale
    return jnp.maximum(x * scale + shift, 0.0)


def _mxu(h, w_ref, bias=None):
    """bf16 MXU matmul with f32 accumulation."""
    out = jnp.dot(h.astype(jnp.bfloat16), w_ref[...],
                  preferred_element_type=jnp.float32)
    return out if bias is None else out + bias


def simnet_kernel(x1_ref, x2_ref,
                  g1_ref, b1_ref, g2_ref, b2_ref, w1_ref, w2_ref, c0_ref,
                  *rest):
    # rest = 4 blocks x (gamma, beta, W, bias)  [3 hidden + padded head], out_ref
    blk_refs, out_ref = rest[:-1], rest[-1]

    x1 = x1_ref[...].astype(jnp.float32)
    x2 = x2_ref[...].astype(jnp.float32)

    # Layer 0: BN stats/affine for features [:D] depend only on x1 and for
    # [D:] only on x2, so no concat is needed; first Linear is split-K.
    h1 = _bn_relu(x1, g1_ref[...], b1_ref[...])
    h2 = _bn_relu(x2, g2_ref[...], b2_ref[...])
    x = _mxu(h1, w1_ref) + _mxu(h2, w2_ref) + c0_ref[...]

    for i in range(len(blk_refs) // 4):
        g, b, w, c = blk_refs[4 * i: 4 * i + 4]
        x = _mxu(_bn_relu(x, g[...], b[...]), w, c[...])

    out_ref[...] = x.astype(out_ref.dtype)


def similarity_network(x1, x2, params):
    """params: 5 tuples (gamma(1,fin), beta(1,fin), W(fin,fout), bias(1,fout));
    layer 0 has fin=2D, hidden layers fin=fout=D, head fout=2."""
    B, D = x1.shape
    (g0, b0, w0, c0), *mid, (gh, bh, wh, ch) = params

    # Split layer-0 params along the input-feature axis (x1 half / x2 half).
    g1, g2 = g0[:, :D], g0[:, D:]
    b1, b2 = b0[:, :D], b0[:, D:]
    w1, w2 = w0[:D, :], w0[D:, :]

    # Zero-pad the 2-wide head to lane-dense 128 columns (sliced after the call).
    nout = wh.shape[1]
    wh_p = jnp.zeros((D, HEAD_PAD), wh.dtype).at[:, :nout].set(wh)
    ch_p = jnp.zeros((1, HEAD_PAD), ch.dtype).at[:, :nout].set(ch)

    bf16 = lambda w: w.astype(jnp.bfloat16)   # MXU-native; accumulation stays f32

    flat = [g1, b1, g2, b2, bf16(w1), bf16(w2), c0]
    for (g, b, w, c) in mid:
        flat += [g, b, bf16(w), c]
    flat += [gh, bh, bf16(wh_p), ch_p]

    def full_spec(a):
        # whole-array block; batch is small enough to keep resident in VMEM
        return pl.BlockSpec(a.shape, lambda: (0,) * a.ndim)

    out = pl.pallas_call(
        simnet_kernel,
        out_shape=jax.ShapeDtypeStruct((B, HEAD_PAD), jnp.float32),
        grid=(),   # single invocation: batch-stat BN needs the whole batch
        in_specs=[full_spec(x1), full_spec(x2)] + [full_spec(a) for a in flat],
        out_specs=pl.BlockSpec((B, HEAD_PAD), lambda: (0, 0)),
        compiler_params=pltpu.CompilerParams(vmem_limit_bytes=8 << 20),
    )(x1, x2, *flat)
    return out[:, :nout]


def _reference(x1, x2, params, matmul_dtype):
    """Pure-JAX reference with original (unfolded) BN math."""
    x = jnp.concatenate([x1, x2], axis=-1)
    for (g, b, w, c) in params:
        mu = jnp.mean(x, axis=0, keepdims=True)
        var = jnp.mean((x - mu) ** 2, axis=0, keepdims=True)   # biased var (PyTorch BN)
        xn = (x - mu) * jax.lax.rsqrt(var + EPS) * g + b
        h = jnp.maximum(xn, 0.0)
        x = jnp.dot(h.astype(matmul_dtype), w.astype(matmul_dtype),
                    preferred_element_type=jnp.float32) + c
    return x


if __name__ == "__main__":
    B = 8              # batch (raise for real workloads: MXU fills at M>=128)
    D = 128            # embedding_dim (small, lane-friendly)
    TOP_HIDDEN = 4

    key = jax.random.PRNGKey(0)
    keys = iter(jax.random.split(key, 64))

    x1 = jax.random.normal(next(keys), (B, D), jnp.float32)
    x2 = jax.random.normal(next(keys), (B, D), jnp.float32)

    # deterministic synthetic parameters (module __init__ only defines shapes)
    dims = [(2 * D, D)] + [(D, D)] * (TOP_HIDDEN - 1) + [(D, 2)]
    params = []
    for fin, fout in dims:
        gamma = 1.0 + 0.1 * jax.random.normal(next(keys), (1, fin), jnp.float32)
        beta = 0.1 * jax.random.normal(next(keys), (1, fin), jnp.float32)
        w = jax.random.normal(next(keys), (fin, fout), jnp.float32) / jnp.sqrt(fin)
        bias = 0.1 * jax.random.normal(next(keys), (1, fout), jnp.float32)
        params.append((gamma, beta, w, bias))

    out = jax.block_until_ready(similarity_network(x1, x2, params))
    assert out.shape == (B, 2)

    # Tight check vs a reference that casts to bf16 at the matmul like the kernel.
    ref_bf16 = _reference(x1, x2, params, jnp.bfloat16)
    assert jnp.allclose(out, ref_bf16, atol=5e-3, rtol=5e-3), (out, ref_bf16)

    # Loose check vs full-f32 module semantics (tolerance covers bf16 rounding).
    ref_f32 = _reference(x1, x2, params, jnp.float32)
    assert jnp.allclose(out, ref_f32, atol=3e-2, rtol=3e-2), (out, ref_f32)

    print("KERNEL_OK")
</pallas_src>

<mosaic_0001>
module attributes {stable_mosaic.version = 11 : i64} {
  func.func @simnet_kernel(%arg0: memref<8x128xf32, #tpu.memory_space<vmem>>, %arg1: memref<8x128xf32, #tpu.memory_space<vmem>>, %arg2: memref<1x128xf32, #tpu.memory_space<vmem>>, %arg3: memref<1x128xf32, #tpu.memory_space<vmem>>, %arg4: memref<1x128xf32, #tpu.memory_space<vmem>>, %arg5: memref<1x128xf32, #tpu.memory_space<vmem>>, %arg6: memref<128x128xbf16, #tpu.memory_space<vmem>>, %arg7: memref<128x128xbf16, #tpu.memory_space<vmem>>, %arg8: memref<1x128xf32, #tpu.memory_space<vmem>>, %arg9: memref<1x128xf32, #tpu.memory_space<vmem>>, %arg10: memref<1x128xf32, #tpu.memory_space<vmem>>, %arg11: memref<128x128xbf16, #tpu.memory_space<vmem>>, %arg12: memref<1x128xf32, #tpu.memory_space<vmem>>, %arg13: memref<1x128xf32, #tpu.memory_space<vmem>>, %arg14: memref<1x128xf32, #tpu.memory_space<vmem>>, %arg15: memref<128x128xbf16, #tpu.memory_space<vmem>>, %arg16: memref<1x128xf32, #tpu.memory_space<vmem>>, %arg17: memref<1x128xf32, #tpu.memory_space<vmem>>, %arg18: memref<1x128xf32, #tpu.memory_space<vmem>>, %arg19: memref<128x128xbf16, #tpu.memory_space<vmem>>, %arg20: memref<1x128xf32, #tpu.memory_space<vmem>>, %arg21: memref<1x128xf32, #tpu.memory_space<vmem>>, %arg22: memref<1x128xf32, #tpu.memory_space<vmem>>, %arg23: memref<128x128xbf16, #tpu.memory_space<vmem>>, %arg24: memref<1x128xf32, #tpu.memory_space<vmem>>, %arg25: memref<8x128xf32, #tpu.memory_space<vmem>>) attributes {dimension_semantics = [], scalar_prefetch = 0 : i64, scratch_operands = 0 : i64, tpu.core_type = #tpu.core_type<tc>} {
    %c0 = arith.constant 0 : index
    %c0_0 = arith.constant 0 : index
    %0 = vector.load %arg0[%c0, %c0_0] : memref<8x128xf32, #tpu.memory_space<vmem>>, vector<8x128xf32>
    %c0_1 = arith.constant 0 : index
    %c0_2 = arith.constant 0 : index
    %1 = vector.load %arg1[%c0_1, %c0_2] : memref<8x128xf32, #tpu.memory_space<vmem>>, vector<8x128xf32>
    %c0_3 = arith.constant 0 : index
    %c0_4 = arith.constant 0 : index
    %2 = vector.load %arg2[%c0_3, %c0_4] : memref<1x128xf32, #tpu.memory_space<vmem>>, vector<1x128xf32>
    %c0_5 = arith.constant 0 : index
    %c0_6 = arith.constant 0 : index
    %3 = vector.load %arg3[%c0_5, %c0_6] : memref<1x128xf32, #tpu.memory_space<vmem>>, vector<1x128xf32>
    %cst = arith.constant dense<0.000000e+00> : vector<128xf32>
    %4 = vector.multi_reduction <add>, %0, %cst [0] : vector<8x128xf32> to vector<128xf32>
    %5 = vector.shape_cast %4 : vector<128xf32> to vector<1x128xf32>
    %6 = arith.mulf %0, %0 : vector<8x128xf32>
    %cst_7 = arith.constant dense<0.000000e+00> : vector<128xf32>
    %7 = vector.multi_reduction <add>, %6, %cst_7 [0] : vector<8x128xf32> to vector<128xf32>
    %8 = vector.shape_cast %7 : vector<128xf32> to vector<1x128xf32>
    %cst_8 = arith.constant 1.250000e-01 : f32
    %9 = vector.broadcast %cst_8 : f32 to vector<1x128xf32>
    %10 = arith.mulf %5, %9 : vector<1x128xf32>
    %cst_9 = arith.constant 1.250000e-01 : f32
    %11 = vector.broadcast %cst_9 : f32 to vector<1x128xf32>
    %12 = arith.mulf %8, %11 : vector<1x128xf32>
    %13 = arith.mulf %10, %10 : vector<1x128xf32>
    %14 = arith.subf %12, %13 : vector<1x128xf32>
    %cst_10 = arith.constant 0.000000e+00 : f32
    %15 = vector.broadcast %cst_10 : f32 to vector<1x128xf32>
    %16 = arith.maximumf %14, %15 : vector<1x128xf32>
    %cst_11 = arith.constant 9.99999974E-6 : f32
    %17 = vector.broadcast %cst_11 : f32 to vector<1x128xf32>
    %18 = arith.addf %16, %17 : vector<1x128xf32>
    %19 = math.rsqrt %18 : vector<1x128xf32>
    %20 = arith.mulf %2, %19 : vector<1x128xf32>
    %21 = arith.mulf %10, %20 : vector<1x128xf32>
    %22 = arith.subf %3, %21 : vector<1x128xf32>
    %23 = vector.broadcast %20 : vector<1x128xf32> to vector<8x128xf32>
    %24 = arith.mulf %0, %23 : vector<8x128xf32>
    %25 = vector.broadcast %22 : vector<1x128xf32> to vector<8x128xf32>
    %26 = arith.addf %24, %25 : vector<8x128xf32>
    %cst_12 = arith.constant 0.000000e+00 : f32
    %27 = vector.broadcast %cst_12 : f32 to vector<8x128xf32>
    %28 = arith.maximumf %26, %27 : vector<8x128xf32>
    %c0_13 = arith.constant 0 : index
    %c0_14 = arith.constant 0 : index
    %29 = vector.load %arg4[%c0_13, %c0_14] : memref<1x128xf32, #tpu.memory_space<vmem>>, vector<1x128xf32>
    %c0_15 = arith.constant 0 : index
    %c0_16 = arith.constant 0 : index
    %30 = vector.load %arg5[%c0_15, %c0_16] : memref<1x128xf32, #tpu.memory_space<vmem>>, vector<1x128xf32>
    %cst_17 = arith.constant dense<0.000000e+00> : vector<128xf32>
    %31 = vector.multi_reduction <add>, %1, %cst_17 [0] : vector<8x128xf32> to vector<128xf32>
    %32 = vector.shape_cast %31 : vector<128xf32> to vector<1x128xf32>
    %33 = arith.mulf %1, %1 : vector<8x128xf32>
    %cst_18 = arith.constant dense<0.000000e+00> : vector<128xf32>
    %34 = vector.multi_reduction <add>, %33, %cst_18 [0] : vector<8x128xf32> to vector<128xf32>
    %35 = vector.shape_cast %34 : vector<128xf32> to vector<1x128xf32>
    %cst_19 = arith.constant 1.250000e-01 : f32
    %36 = vector.broadcast %cst_19 : f32 to vector<1x128xf32>
    %37 = arith.mulf %32, %36 : vector<1x128xf32>
    %cst_20 = arith.constant 1.250000e-01 : f32
    %38 = vector.broadcast %cst_20 : f32 to vector<1x128xf32>
    %39 = arith.mulf %35, %38 : vector<1x128xf32>
    %40 = arith.mulf %37, %37 : vector<1x128xf32>
    %41 = arith.subf %39, %40 : vector<1x128xf32>
    %cst_21 = arith.constant 0.000000e+00 : f32
    %42 = vector.broadcast %cst_21 : f32 to vector<1x128xf32>
    %43 = arith.maximumf %41, %42 : vector<1x128xf32>
    %cst_22 = arith.constant 9.99999974E-6 : f32
    %44 = vector.broadcast %cst_22 : f32 to vector<1x128xf32>
    %45 = arith.addf %43, %44 : vector<1x128xf32>
    %46 = math.rsqrt %45 : vector<1x128xf32>
    %47 = arith.mulf %29, %46 : vector<1x128xf32>
    %48 = arith.mulf %37, %47 : vector<1x128xf32>
    %49 = arith.subf %30, %48 : vector<1x128xf32>
    %50 = vector.broadcast %47 : vector<1x128xf32> to vector<8x128xf32>
    %51 = arith.mulf %1, %50 : vector<8x128xf32>
    %52 = vector.broadcast %49 : vector<1x128xf32> to vector<8x128xf32>
    %53 = arith.addf %51, %52 : vector<8x128xf32>
    %cst_23 = arith.constant 0.000000e+00 : f32
    %54 = vector.broadcast %cst_23 : f32 to vector<8x128xf32>
    %55 = arith.maximumf %53, %54 : vector<8x128xf32>
    %56 = arith.truncf %28 : vector<8x128xf32> to vector<8x128xbf16>
    %c0_24 = arith.constant 0 : index
    %c0_25 = arith.constant 0 : index
    %57 = vector.load %arg6[%c0_24, %c0_25] : memref<128x128xbf16, #tpu.memory_space<vmem>>, vector<128x128xbf16>
    %cst_26 = arith.constant dense<0.000000e+00> : vector<8x128xf32>
    %58 = tpu.matmul %56, %57, %cst_26 {dimension_numbers = #tpu.dot_dimension_numbers<[1], [0], [0], [1], [0, 0, 1, 1], [], []>} : vector<8x128xbf16>, vector<128x128xbf16>, vector<8x128xf32> -> vector<8x128xf32>
    %59 = arith.truncf %55 : vector<8x128xf32> to vector<8x128xbf16>
    %c0_27 = arith.constant 0 : index
    %c0_28 = arith.constant 0 : index
    %60 = vector.load %arg7[%c0_27, %c0_28] : memref<128x128xbf16, #tpu.memory_space<vmem>>, vector<128x128xbf16>
    %cst_29 = arith.constant dense<0.000000e+00> : vector<8x128xf32>
    %61 = tpu.matmul %59, %60, %cst_29 {dimension_numbers = #tpu.dot_dimension_numbers<[1], [0], [0], [1], [0, 0, 1, 1], [], []>} : vector<8x128xbf16>, vector<128x128xbf16>, vector<8x128xf32> -> vector<8x128xf32>
    %62 = arith.addf %58, %61 : vector<8x128xf32>
    %c0_30 = arith.constant 0 : index
    %c0_31 = arith.constant 0 : index
    %63 = vector.load %arg8[%c0_30, %c0_31] : memref<1x128xf32, #tpu.memory_space<vmem>>, vector<1x128xf32>
    %64 = vector.broadcast %63 : vector<1x128xf32> to vector<8x128xf32>
    %65 = arith.addf %62, %64 : vector<8x128xf32>
    %c0_32 = arith.constant 0 : index
    %c0_33 = arith.constant 0 : index
    %66 = vector.load %arg9[%c0_32, %c0_33] : memref<1x128xf32, #tpu.memory_space<vmem>>, vector<1x128xf32>
    %c0_34 = arith.constant 0 : index
    %c0_35 = arith.constant 0 : index
    %67 = vector.load %arg10[%c0_34, %c0_35] : memref<1x128xf32, #tpu.memory_space<vmem>>, vector<1x128xf32>
    %cst_36 = arith.constant dense<0.000000e+00> : vector<128xf32>
    %68 = vector.multi_reduction <add>, %65, %cst_36 [0] : vector<8x128xf32> to vector<128xf32>
    %69 = vector.shape_cast %68 : vector<128xf32> to vector<1x128xf32>
    %70 = arith.mulf %65, %65 : vector<8x128xf32>
    %cst_37 = arith.constant dense<0.000000e+00> : vector<128xf32>
    %71 = vector.multi_reduction <add>, %70, %cst_37 [0] : vector<8x128xf32> to vector<128xf32>
    %72 = vector.shape_cast %71 : vector<128xf32> to vector<1x128xf32>
    %cst_38 = arith.constant 1.250000e-01 : f32
    %73 = vector.broadcast %cst_38 : f32 to vector<1x128xf32>
    %74 = arith.mulf %69, %73 : vector<1x128xf32>
    %cst_39 = arith.constant 1.250000e-01 : f32
    %75 = vector.broadcast %cst_39 : f32 to vector<1x128xf32>
    %76 = arith.mulf %72, %75 : vector<1x128xf32>
    %77 = arith.mulf %74, %74 : vector<1x128xf32>
    %78 = arith.subf %76, %77 : vector<1x128xf32>
    %cst_40 = arith.constant 0.000000e+00 : f32
    %79 = vector.broadcast %cst_40 : f32 to vector<1x128xf32>
    %80 = arith.maximumf %78, %79 : vector<1x128xf32>
    %cst_41 = arith.constant 9.99999974E-6 : f32
    %81 = vector.broadcast %cst_41 : f32 to vector<1x128xf32>
    %82 = arith.addf %80, %81 : vector<1x128xf32>
    %83 = math.rsqrt %82 : vector<1x128xf32>
    %84 = arith.mulf %66, %83 : vector<1x128xf32>
    %85 = arith.mulf %74, %84 : vector<1x128xf32>
    %86 = arith.subf %67, %85 : vector<1x128xf32>
    %87 = vector.broadcast %84 : vector<1x128xf32> to vector<8x128xf32>
    %88 = arith.mulf %65, %87 : vector<8x128xf32>
    %89 = vector.broadcast %86 : vector<1x128xf32> to vector<8x128xf32>
    %90 = arith.addf %88, %89 : vector<8x128xf32>
    %cst_42 = arith.constant 0.000000e+00 : f32
    %91 = vector.broadcast %cst_42 : f32 to vector<8x128xf32>
    %92 = arith.maximumf %90, %91 : vector<8x128xf32>
    %c0_43 = arith.constant 0 : index
    %c0_44 = arith.constant 0 : index
    %93 = vector.load %arg12[%c0_43, %c0_44] : memref<1x128xf32, #tpu.memory_space<vmem>>, vector<1x128xf32>
    %94 = arith.truncf %92 : vector<8x128xf32> to vector<8x128xbf16>
    %c0_45 = arith.constant 0 : index
    %c0_46 = arith.constant 0 : index
    %95 = vector.load %arg11[%c0_45, %c0_46] : memref<128x128xbf16, #tpu.memory_space<vmem>>, vector<128x128xbf16>
    %cst_47 = arith.constant dense<0.000000e+00> : vector<8x128xf32>
    %96 = tpu.matmul %94, %95, %cst_47 {dimension_numbers = #tpu.dot_dimension_numbers<[1], [0], [0], [1], [0, 0, 1, 1], [], []>} : vector<8x128xbf16>, vector<128x128xbf16>, vector<8x128xf32> -> vector<8x128xf32>
    %97 = vector.broadcast %93 : vector<1x128xf32> to vector<8x128xf32>
    %98 = arith.addf %96, %97 : vector<8x128xf32>
    %c0_48 = arith.constant 0 : index
    %c0_49 = arith.constant 0 : index
    %99 = vector.load %arg13[%c0_48, %c0_49] : memref<1x128xf32, #tpu.memory_space<vmem>>, vector<1x128xf32>
    %c0_50 = arith.constant 0 : index
    %c0_51 = arith.constant 0 : index
    %100 = vector.load %arg14[%c0_50, %c0_51] : memref<1x128xf32, #tpu.memory_space<vmem>>, vector<1x128xf32>
    %cst_52 = arith.constant dense<0.000000e+00> : vector<128xf32>
    %101 = vector.multi_reduction <add>, %98, %cst_52 [0] : vector<8x128xf32> to vector<128xf32>
    %102 = vector.shape_cast %101 : vector<128xf32> to vector<1x128xf32>
    %103 = arith.mulf %98, %98 : vector<8x128xf32>
    %cst_53 = arith.constant dense<0.000000e+00> : vector<128xf32>
    %104 = vector.multi_reduction <add>, %103, %cst_53 [0] : vector<8x128xf32> to vector<128xf32>
    %105 = vector.shape_cast %104 : vector<128xf32> to vector<1x128xf32>
    %cst_54 = arith.constant 1.250000e-01 : f32
    %106 = vector.broadcast %cst_54 : f32 to vector<1x128xf32>
    %107 = arith.mulf %102, %106 : vector<1x128xf32>
    %cst_55 = arith.constant 1.250000e-01 : f32
    %108 = vector.broadcast %cst_55 : f32 to vector<1x128xf32>
    %109 = arith.mulf %105, %108 : vector<1x128xf32>
    %110 = arith.mulf %107, %107 : vector<1x128xf32>
    %111 = arith.subf %109, %110 : vector<1x128xf32>
    %cst_56 = arith.constant 0.000000e+00 : f32
    %112 = vector.broadcast %cst_56 : f32 to vector<1x128xf32>
    %113 = arith.maximumf %111, %112 : vector<1x128xf32>
    %cst_57 = arith.constant 9.99999974E-6 : f32
    %114 = vector.broadcast %cst_57 : f32 to vector<1x128xf32>
    %115 = arith.addf %113, %114 : vector<1x128xf32>
    %116 = math.rsqrt %115 : vector<1x128xf32>
    %117 = arith.mulf %99, %116 : vector<1x128xf32>
    %118 = arith.mulf %107, %117 : vector<1x128xf32>
    %119 = arith.subf %100, %118 : vector<1x128xf32>
    %120 = vector.broadcast %117 : vector<1x128xf32> to vector<8x128xf32>
    %121 = arith.mulf %98, %120 : vector<8x128xf32>
    %122 = vector.broadcast %119 : vector<1x128xf32> to vector<8x128xf32>
    %123 = arith.addf %121, %122 : vector<8x128xf32>
    %cst_58 = arith.constant 0.000000e+00 : f32
    %124 = vector.broadcast %cst_58 : f32 to vector<8x128xf32>
    %125 = arith.maximumf %123, %124 : vector<8x128xf32>
    %c0_59 = arith.constant 0 : index
    %c0_60 = arith.constant 0 : index
    %126 = vector.load %arg16[%c0_59, %c0_60] : memref<1x128xf32, #tpu.memory_space<vmem>>, vector<1x128xf32>
    %127 = arith.truncf %125 : vector<8x128xf32> to vector<8x128xbf16>
    %c0_61 = arith.constant 0 : index
    %c0_62 = arith.constant 0 : index
    %128 = vector.load %arg15[%c0_61, %c0_62] : memref<128x128xbf16, #tpu.memory_space<vmem>>, vector<128x128xbf16>
    %cst_63 = arith.constant dense<0.000000e+00> : vector<8x128xf32>
    %129 = tpu.matmul %127, %128, %cst_63 {dimension_numbers = #tpu.dot_dimension_numbers<[1], [0], [0], [1], [0, 0, 1, 1], [], []>} : vector<8x128xbf16>, vector<128x128xbf16>, vector<8x128xf32> -> vector<8x128xf32>
    %130 = vector.broadcast %126 : vector<1x128xf32> to vector<8x128xf32>
    %131 = arith.addf %129, %130 : vector<8x128xf32>
    %c0_64 = arith.constant 0 : index
    %c0_65 = arith.constant 0 : index
    %132 = vector.load %arg17[%c0_64, %c0_65] : memref<1x128xf32, #tpu.memory_space<vmem>>, vector<1x128xf32>
    %c0_66 = arith.constant 0 : index
    %c0_67 = arith.constant 0 : index
    %133 = vector.load %arg18[%c0_66, %c0_67] : memref<1x128xf32, #tpu.memory_space<vmem>>, vector<1x128xf32>
    %cst_68 = arith.constant dense<0.000000e+00> : vector<128xf32>
    %134 = vector.multi_reduction <add>, %131, %cst_68 [0] : vector<8x128xf32> to vector<128xf32>
    %135 = vector.shape_cast %134 : vector<128xf32> to vector<1x128xf32>
    %136 = arith.mulf %131, %131 : vector<8x128xf32>
    %cst_69 = arith.constant dense<0.000000e+00> : vector<128xf32>
    %137 = vector.multi_reduction <add>, %136, %cst_69 [0] : vector<8x128xf32> to vector<128xf32>
    %138 = vector.shape_cast %137 : vector<128xf32> to vector<1x128xf32>
    %cst_70 = arith.constant 1.250000e-01 : f32
    %139 = vector.broadcast %cst_70 : f32 to vector<1x128xf32>
    %140 = arith.mulf %135, %139 : vector<1x128xf32>
    %cst_71 = arith.constant 1.250000e-01 : f32
    %141 = vector.broadcast %cst_71 : f32 to vector<1x128xf32>
    %142 = arith.mulf %138, %141 : vector<1x128xf32>
    %143 = arith.mulf %140, %140 : vector<1x128xf32>
    %144 = arith.subf %142, %143 : vector<1x128xf32>
    %cst_72 = arith.constant 0.000000e+00 : f32
    %145 = vector.broadcast %cst_72 : f32 to vector<1x128xf32>
    %146 = arith.maximumf %144, %145 : vector<1x128xf32>
    %cst_73 = arith.constant 9.99999974E-6 : f32
    %147 = vector.broadcast %cst_73 : f32 to vector<1x128xf32>
    %148 = arith.addf %146, %147 : vector<1x128xf32>
    %149 = math.rsqrt %148 : vector<1x128xf32>
    %150 = arith.mulf %132, %149 : vector<1x128xf32>
    %151 = arith.mulf %140, %150 : vector<1x128xf32>
    %152 = arith.subf %133, %151 : vector<1x128xf32>
    %153 = vector.broadcast %150 : vector<1x128xf32> to vector<8x128xf32>
    %154 = arith.mulf %131, %153 : vector<8x128xf32>
    %155 = vector.broadcast %152 : vector<1x128xf32> to vector<8x128xf32>
    %156 = arith.addf %154, %155 : vector<8x128xf32>
    %cst_74 = arith.constant 0.000000e+00 : f32
    %157 = vector.broadcast %cst_74 : f32 to vector<8x128xf32>
    %158 = arith.maximumf %156, %157 : vector<8x128xf32>
    %c0_75 = arith.constant 0 : index
    %c0_76 = arith.constant 0 : index
    %159 = vector.load %arg20[%c0_75, %c0_76] : memref<1x128xf32, #tpu.memory_space<vmem>>, vector<1x128xf32>
    %160 = arith.truncf %158 : vector<8x128xf32> to vector<8x128xbf16>
    %c0_77 = arith.constant 0 : index
    %c0_78 = arith.constant 0 : index
    %161 = vector.load %arg19[%c0_77, %c0_78] : memref<128x128xbf16, #tpu.memory_space<vmem>>, vector<128x128xbf16>
    %cst_79 = arith.constant dense<0.000000e+00> : vector<8x128xf32>
    %162 = tpu.matmul %160, %161, %cst_79 {dimension_numbers = #tpu.dot_dimension_numbers<[1], [0], [0], [1], [0, 0, 1, 1], [], []>} : vector<8x128xbf16>, vector<128x128xbf16>, vector<8x128xf32> -> vector<8x128xf32>
    %163 = vector.broadcast %159 : vector<1x128xf32> to vector<8x128xf32>
    %164 = arith.addf %162, %163 : vector<8x128xf32>
    %c0_80 = arith.constant 0 : index
    %c0_81 = arith.constant 0 : index
    %165 = vector.load %arg21[%c0_80, %c0_81] : memref<1x128xf32, #tpu.memory_space<vmem>>, vector<1x128xf32>
    %c0_82 = arith.constant 0 : index
    %c0_83 = arith.constant 0 : index
    %166 = vector.load %arg22[%c0_82, %c0_83] : memref<1x128xf32, #tpu.memory_space<vmem>>, vector<1x128xf32>
    %cst_84 = arith.constant dense<0.000000e+00> : vector<128xf32>
    %167 = vector.multi_reduction <add>, %164, %cst_84 [0] : vector<8x128xf32> to vector<128xf32>
    %168 = vector.shape_cast %167 : vector<128xf32> to vector<1x128xf32>
    %169 = arith.mulf %164, %164 : vector<8x128xf32>
    %cst_85 = arith.constant dense<0.000000e+00> : vector<128xf32>
    %170 = vector.multi_reduction <add>, %169, %cst_85 [0] : vector<8x128xf32> to vector<128xf32>
    %171 = vector.shape_cast %170 : vector<128xf32> to vector<1x128xf32>
    %cst_86 = arith.constant 1.250000e-01 : f32
    %172 = vector.broadcast %cst_86 : f32 to vector<1x128xf32>
    %173 = arith.mulf %168, %172 : vector<1x128xf32>
    %cst_87 = arith.constant 1.250000e-01 : f32
    %174 = vector.broadcast %cst_87 : f32 to vector<1x128xf32>
    %175 = arith.mulf %171, %174 : vector<1x128xf32>
    %176 = arith.mulf %173, %173 : vector<1x128xf32>
    %177 = arith.subf %175, %176 : vector<1x128xf32>
    %cst_88 = arith.constant 0.000000e+00 : f32
    %178 = vector.broadcast %cst_88 : f32 to vector<1x128xf32>
    %179 = arith.maximumf %177, %178 : vector<1x128xf32>
    %cst_89 = arith.constant 9.99999974E-6 : f32
    %180 = vector.broadcast %cst_89 : f32 to vector<1x128xf32>
    %181 = arith.addf %179, %180 : vector<1x128xf32>
    %182 = math.rsqrt %181 : vector<1x128xf32>
    %183 = arith.mulf %165, %182 : vector<1x128xf32>
    %184 = arith.mulf %173, %183 : vector<1x128xf32>
    %185 = arith.subf %166, %184 : vector<1x128xf32>
    %186 = vector.broadcast %183 : vector<1x128xf32> to vector<8x128xf32>
    %187 = arith.mulf %164, %186 : vector<8x128xf32>
    %188 = vector.broadcast %185 : vector<1x128xf32> to vector<8x128xf32>
    %189 = arith.addf %187, %188 : vector<8x128xf32>
    %cst_90 = arith.constant 0.000000e+00 : f32
    %190 = vector.broadcast %cst_90 : f32 to vector<8x128xf32>
    %191 = arith.maximumf %189, %190 : vector<8x128xf32>
    %c0_91 = arith.constant 0 : index
    %c0_92 = arith.constant 0 : index
    %192 = vector.load %arg24[%c0_91, %c0_92] : memref<1x128xf32, #tpu.memory_space<vmem>>, vector<1x128xf32>
    %193 = arith.truncf %191 : vector<8x128xf32> to vector<8x128xbf16>
    %c0_93 = arith.constant 0 : index
    %c0_94 = arith.constant 0 : index
    %194 = vector.load %arg23[%c0_93, %c0_94] : memref<128x128xbf16, #tpu.memory_space<vmem>>, vector<128x128xbf16>
    %cst_95 = arith.constant dense<0.000000e+00> : vector<8x128xf32>
    %195 = tpu.matmul %193, %194, %cst_95 {dimension_numbers = #tpu.dot_dimension_numbers<[1], [0], [0], [1], [0, 0, 1, 1], [], []>} : vector<8x128xbf16>, vector<128x128xbf16>, vector<8x128xf32> -> vector<8x128xf32>
    %196 = vector.broadcast %192 : vector<1x128xf32> to vector<8x128xf32>
    %197 = arith.addf %195, %196 : vector<8x128xf32>
    %c0_96 = arith.constant 0 : index
    %c0_97 = arith.constant 0 : index
    %198 = vector.load %arg25[%c0_96, %c0_97] : memref<8x128xf32, #tpu.memory_space<vmem>>, vector<8x128xf32>
    tpu.vector_store %arg25[%c0_96, %c0_97], %197 {strides = array<i32>} : memref<8x128xf32, #tpu.memory_space<vmem>>, vector<8x128xf32>,
    return
  }
}

</mosaic_0001>

<bundles_post_ra>
// kernel: tpu_custom_call.1
= control target key start
LH: loop header
LB: loop body
LE: loop exit
PB: predicated region body
PF: predicated region fallthrough
CT: control target
= control target key end

     0   :  { %s2277_s0 = inlined_call_operand.hbm [shape: f32[8,128], index: 0, kind: input, shape index: {}]   ;;  %s2278_s1 = inlined_call_operand.hbm [shape: f32[8,128], index: 1, kind: input, shape index: {}]   ;;  %s2279_s2 = inlined_call_operand.vmem [shape: f32[1,128], index: 2, kind: input, shape index: {}]   ;;  %s2280_s3 = inlined_call_operand.vmem [shape: f32[1,128], index: 3, kind: input, shape index: {}]   ;;  %s2281_s4 = inlined_call_operand.vmem [shape: f32[1,128], index: 4, kind: input, shape index: {}]   ;;  %s2282_s5 = inlined_call_operand.vmem [shape: f32[1,128], index: 5, kind: input, shape index: {}]   ;;  %s2283_s6 = inlined_call_operand.hbm [shape: bf16[128,128], index: 6, kind: input, shape index: {}]   ;;  %s2284_s7 = inlined_call_operand.hbm [shape: bf16[128,128], index: 7, kind: input, shape index: {}]   ;;  %s2285_s8 = inlined_call_operand.vmem [shape: f32[1,128], index: 8, kind: input, shape index: {}]   ;;  %s2286_s9 = inlined_call_operand.vmem [shape: f32[1,128], index: 9, kind: input, shape index: {}]   ;;  %s2287_s10 = inlined_call_operand.vmem [shape: f32[1,128], index: 10, kind: input, shape index: {}]   ;;  %s2288_s11 = inlined_call_operand.hbm [shape: bf16[128,128], index: 11, kind: input, shape index: {}]   ;;  %s2289_s12 = inlined_call_operand.hbm [shape: f32[1,128], index: 12, kind: input, shape index: {}]   ;;  %s2290_s13 = inlined_call_operand.hbm [shape: f32[1,128], index: 13, kind: input, shape index: {}]   ;;  %s2291_s14 = inlined_call_operand.hbm [shape: f32[1,128], index: 14, kind: input, shape index: {}]   ;;  %s2292_s15 = inlined_call_operand.hbm [shape: bf16[128,128], index: 15, kind: input, shape index: {}]   ;;  %s2293_s16 = inlined_call_operand.hbm [shape: f32[1,128], index: 16, kind: input, shape index: {}]   ;;  %s2294_s17 = inlined_call_operand.hbm [shape: f32[1,128], index: 17, kind: input, shape index: {}]   ;;  %s2295_s18 = inlined_call_operand.hbm [shape: f32[1,128], index: 18, kind: input, shape index: {}]   ;;  %s2296_s19 = inlined_call_operand.vmem [shape: bf16[128,128], index: 19, kind: input, shape index: {}]   ;;  %s2297_s20 = inlined_call_operand.vmem [shape: f32[1,128], index: 20, kind: input, shape index: {}]   ;;  %s2298_s21 = inlined_call_operand.vmem [shape: f32[1,128], index: 21, kind: input, shape index: {}]   ;;  %s2299_s22 = inlined_call_operand.vmem [shape: f32[1,128], index: 22, kind: input, shape index: {}]   ;;  %s2300_s23 = inlined_call_operand.hbm [shape: bf16[128,128], index: 23, kind: input, shape index: {}]   ;;  %s2301_s24 = inlined_call_operand.vmem [shape: f32[1,128], index: 24, kind: input, shape index: {}]   ;;  %s2302_s25 = inlined_call_operand.hbm [shape: f32[8,128], index: 25, kind: output, shape index: {}]  }
   0x1   :  { %2308 = sst [smem:[#allocation32_spill]] %s2277_s0 }
   0x2   :  { %2309 = sst [smem:[#allocation33_spill]] %s2278_s1 }
   0x3   :  { %2310 = sst [smem:[#allocation34_spill]] %s2279_s2 }
   0x4   :  { %2311 = sst [smem:[#allocation35_spill]] %s2280_s3 }
   0x5   :  { %2312 = sst [smem:[#allocation36_spill]] %s2281_s4 }
   0x6   :  { %2313 = sst [smem:[#allocation37_spill]] %s2282_s5 }
   0x7   :  { %2314 = sst [smem:[#allocation38_spill]] %s2283_s6 }
   0x8   :  { %2315 = sst [smem:[#allocation39_spill]] %s2284_s7 }
   0x9   :  { %2316 = sst [smem:[#allocation40_spill]] %s2285_s8 }
   0xa   :  { %2317 = sst [smem:[#allocation41_spill]] %s2286_s9 }
   0xb   :  { %2318 = sst [smem:[#allocation42_spill]] %s2302_s25 }
   0xc   :  { %30 = vsyncpa [#allocation3], 0 }
   0xd   :  { %31 = vsyncpa [#allocation6], 0 }
   0xe   :  { %32 = vsyncpa [#allocation9], 0 }
   0xf   :  { %33 = vsyncpa [#allocation12], 0 }
  0x10   :  { %34 = vsyncpa [#allocation15], 0 }
  0x11   :  { %35 = vsyncpa [#allocation18], 0 }
  0x12   :  { %36 = vsyncpa [#allocation21], 0 }
  0x13   :  { %37 = vsyncpa [#allocation4], 0  ;;  %s1801_s29 = smov [#allocation5]   ;;  %s2319_s7 = sld [smem:[#allocation33_spill]] }
  0x14   :  { %s54_s2 = sshll.u32 %s1801_s29, 4  ;;  %s55_s2 = int_to_ptr.vmem [resolvable:$true] %s54_s2 }
  0x19   :  { %s1477_s3 = scalar_lea.hbm %s2319_s7, 128 }
  0x1a   :  { %p1478_p0 = scmp.ne.s32.totalorder %s2319_s7, %s1477_s3  ;;  %p1481_p1 = scmp.lt.u32.totalorder %s1477_s3, %s2319_s7 }
  0x1c   :  { %p1483_p2 = pnand %p1481_p1, %p1478_p0 }
  0x1e   :  { %1486 = shalt.err (!%p1483_p2)
}
  0x1f   :  { %s1487_s4 = scalar_lea.vmem %s55_s2, 128  ;;  %p1492_p4 = scmp.lt.s32.totalorder %s55_s2, %s55_s2 }
  0x20   :  { %p1488_p3 = scmp.ne.s32.totalorder %s55_s2, %s1487_s4  ;;  %p1493_p5 = scmp.lt.s32.totalorder %s1487_s4, %s1487_s4 }
  0x22   :  { %p1494_p6 = por %p1493_p5, %p1492_p4 }
  0x24   :  { %p1495_p7 = pnand %p1494_p6, %p1488_p3 }
  0x26   :  { %1498 = shalt.err (!%p1495_p7)
}
  0x27   :  { %57 = dma.hbm_to_vmem [thread:$0]  %s2319_s7, 128, %s55_s2, [#allocation6]  }
  0x28   :  { %s1802_s5 = smov [#allocation8]   ;;  %s1803_s29 = smov [#allocation11]  }
  0x29   :  { %s83_s0 = sshll.u32 %s1802_s5, 4  ;;  %s114_s6 = sshll.u32 %s1803_s29, 4  ;;  %s84_s0 = int_to_ptr.vmem [resolvable:$true] %s83_s0  ;;  %s115_s6 = int_to_ptr.vmem [resolvable:$true] %s114_s6 }
  0x2a   :  { %s2320_s26 = sld [smem:[#allocation39_spill]] }
  0x30   :  { %s1499_s1 = scalar_lea.hbm %s2320_s26, 1024 }
  0x31   :  { %p1500_p8 = scmp.ne.s32.totalorder %s2320_s26, %s1499_s1  ;;  %p1503_p9 = scmp.lt.u32.totalorder %s1499_s1, %s2320_s26 }
  0x33   :  { %p1505_p10 = pnand %p1503_p9, %p1500_p8 }
  0x35   :  { %1508 = shalt.err (!%p1505_p10)
}
  0x36   :  { %s1509_s2 = scalar_lea.vmem %s84_s0, 1024  ;;  %p1514_p12 = scmp.lt.s32.totalorder %s84_s0, %s84_s0 }
  0x37   :  { %p1510_p11 = scmp.ne.s32.totalorder %s84_s0, %s1509_s2  ;;  %p1515_p13 = scmp.lt.s32.totalorder %s1509_s2, %s1509_s2 }
  0x39   :  { %p1516_p0 = por %p1515_p13, %p1514_p12 }
  0x3b   :  { %p1517_p1 = pnand %p1516_p0, %p1510_p11 }
  0x3d   :  { %1520 = shalt.err (!%p1517_p1)
}
  0x3e   :  { %s1804_s7 = smov 64   ;;  %s1805_s28 = smov 4  }
  0x3f   :  { %89 = dma.hbm_to_vmem [thread:$0]  %s2320_s26, 1024, %s84_s0, [#allocation9], %s1804_s7, %s1804_s7, %s1805_s28  }
  0x40   :  { %s1521_s30 = scalar_lea.hbm %s2289_s12, 16 }
  0x41   :  { %p1522_p2 = scmp.ne.s32.totalorder %s2289_s12, %s1521_s30  ;;  %p1525_p3 = scmp.lt.u32.totalorder %s1521_s30, %s2289_s12 }
  0x43   :  { %p1527_p4 = pnand %p1525_p3, %p1522_p2 }
  0x45   :  { %1530 = shalt.err (!%p1527_p4)
}
  0x46   :  { %s1531_s4 = scalar_lea.vmem %s115_s6, 16  ;;  %s1535_s2 = scalar_lea.vmem %s115_s6, 32 }
  0x47   :  { %p1532_p5 = scmp.ne.s32.totalorder %s115_s6, %s1531_s4  ;;  %p1536_p6 = scmp.lt.s32.totalorder %s115_s6, %s115_s6 }
  0x48   :  { %p1537_p7 = scmp.lt.s32.totalorder %s1535_s2, %s1531_s4 }
  0x4a   :  { %p1538_p8 = por %p1537_p7, %p1536_p6 }
  0x4c   :  { %p1539_p9 = pnand %p1538_p8, %p1532_p5 }
  0x4e   :  { %1542 = shalt.err (!%p1539_p9)
}
  0x4f   :  { %117 = dma.hbm_to_vmem [thread:$0]  %s2289_s12, 16, %s115_s6, [#allocation12]  }
  0x50   :  { %s1806_s9 = smov [#allocation14]   ;;  %s1807_s25 = smov [#allocation17]  }
  0x51   :  { %s134_s5 = sshll.u32 %s1806_s9, 4  ;;  %s156_s29 = sshll.u32 %s1807_s25, 4  ;;  %s135_s5 = int_to_ptr.vmem [resolvable:$true] %s134_s5  ;;  %s157_s29 = int_to_ptr.vmem [resolvable:$true] %s156_s29 }
  0x52   :  { %s1543_s1 = scalar_lea.hbm %s2291_s14, 16 }
  0x53   :  { %p1544_p10 = scmp.ne.s32.totalorder %s2291_s14, %s1543_s1  ;;  %p1547_p11 = scmp.lt.u32.totalorder %s1543_s1, %s2291_s14 }
  0x55   :  { %p1549_p12 = pnand %p1547_p11, %p1544_p10 }
  0x57   :  { %1552 = shalt.err (!%p1549_p12)
}
  0x58   :  { %s1553_s12 = scalar_lea.vmem %s135_s5, 16  ;;  %s1557_s6 = scalar_lea.vmem %s135_s5, 32 }
  0x59   :  { %p1554_p13 = scmp.ne.s32.totalorder %s135_s5, %s1553_s12  ;;  %p1558_p0 = scmp.lt.s32.totalorder %s135_s5, %s135_s5 }
  0x5a   :  { %p1559_p1 = scmp.lt.s32.totalorder %s1557_s6, %s1553_s12 }
  0x5c   :  { %p1560_p2 = por %p1559_p1, %p1558_p0 }
  0x5e   :  { %p1561_p3 = pnand %p1560_p2, %p1554_p13 }
  0x60   :  { %1564 = shalt.err (!%p1561_p3)
}
  0x61   :  { %137 = dma.hbm_to_vmem [thread:$0]  %s2291_s14, 16, %s135_s5, [#allocation15]  }
  0x62   :  { %s1565_s30 = scalar_lea.hbm %s2293_s16, 16 }
  0x63   :  { %p1566_p4 = scmp.ne.s32.totalorder %s2293_s16, %s1565_s30  ;;  %p1569_p5 = scmp.lt.u32.totalorder %s1565_s30, %s2293_s16 }
  0x65   :  { %p1571_p6 = pnand %p1569_p5, %p1566_p4 }
  0x67   :  { %1574 = shalt.err (!%p1571_p6)
}
  0x68   :  { %s1575_s4 = scalar_lea.vmem %s157_s29, 16  ;;  %s1579_s2 = scalar_lea.vmem %s157_s29, 32 }
  0x69   :  { %p1576_p7 = scmp.ne.s32.totalorder %s157_s29, %s1575_s4  ;;  %p1580_p8 = scmp.lt.s32.totalorder %s157_s29, %s157_s29 }
  0x6a   :  { %p1581_p9 = scmp.lt.s32.totalorder %s1579_s2, %s1575_s4 }
  0x6c   :  { %p1582_p10 = por %p1581_p9, %p1580_p8 }
  0x6e   :  { %p1583_p11 = pnand %p1582_p10, %p1576_p7 }
  0x70   :  { %1586 = shalt.err (!%p1583_p11)
}
  0x71   :  { %159 = dma.hbm_to_vmem [thread:$0]  %s2293_s16, 16, %s157_s29, [#allocation18]  }
  0x72   :  { %s1808_s12 = smov [#allocation20]   ;;  %s1809_s0 = smov [#allocation2]  }
  0x73   :  { %s176_s6 = sshll.u32 %s1808_s12, 4  ;;  %s44_s26 = sshll.u32 %s1809_s0, 4  ;;  %s177_s6 = int_to_ptr.vmem [resolvable:$true] %s176_s6  ;;  %s45_s26 = int_to_ptr.vmem [resolvable:$true] %s44_s26 }
  0x74   :  { %s1587_s30 = scalar_lea.hbm %s2295_s18, 16 }
  0x75   :  { %p1588_p12 = scmp.ne.s32.totalorder %s2295_s18, %s1587_s30  ;;  %p1591_p13 = scmp.lt.u32.totalorder %s1587_s30, %s2295_s18 }
  0x77   :  { %p1593_p0 = pnand %p1591_p13, %p1588_p12 }
  0x79   :  { %1596 = shalt.err (!%p1593_p0)
}
  0x7a   :  { %s1597_s16 = scalar_lea.vmem %s177_s6, 16  ;;  %s1601_s29 = scalar_lea.vmem %s177_s6, 32 }
  0x7b   :  { %p1598_p1 = scmp.ne.s32.totalorder %s177_s6, %s1597_s16  ;;  %p1602_p2 = scmp.lt.s32.totalorder %s177_s6, %s177_s6 }
  0x7c   :  { %p1603_p3 = scmp.lt.s32.totalorder %s1601_s29, %s1597_s16 }
  0x7e   :  { %p1604_p4 = por %p1603_p3, %p1602_p2 }
  0x80   :  { %p1605_p5 = pnand %p1604_p4, %p1598_p1 }
  0x82   :  { %1608 = shalt.err (!%p1605_p5)
}
  0x83   :  { %179 = dma.hbm_to_vmem [thread:$0]  %s2295_s18, 16, %s177_s6, [#allocation21]  }
  0x84   :  { %s2321_s12 = sld [smem:[#allocation32_spill]] }
  0x8a   :  { %s1609_s0 = scalar_lea.hbm %s2321_s12, 128 }
  0x8b   :  { %p1610_p6 = scmp.ne.s32.totalorder %s2321_s12, %s1609_s0  ;;  %p1613_p7 = scmp.lt.u32.totalorder %s1609_s0, %s2321_s12 }
  0x8d   :  { %p1615_p8 = pnand %p1613_p7, %p1610_p6 }
  0x8f   :  { %1618 = shalt.err (!%p1615_p8)
}
  0x90   :  { %s1619_s1 = scalar_lea.vmem %s45_s26, 128  ;;  %p1624_p10 = scmp.lt.s32.totalorder %s45_s26, %s45_s26 }
  0x91   :  { %p1620_p9 = scmp.ne.s32.totalorder %s45_s26, %s1619_s1  ;;  %p1625_p11 = scmp.lt.s32.totalorder %s1619_s1, %s1619_s1 }
  0x93   :  { %p1626_p12 = por %p1625_p11, %p1624_p10 }
  0x95   :  { %p1627_p13 = pnand %p1626_p12, %p1620_p9 }
  0x97   :  { %1630 = shalt.err (!%p1627_p13)
}
  0x98   :  { %47 = dma.hbm_to_vmem [thread:$0]  %s2321_s12, 128, %s45_s26, [#allocation3]  }
  0x99   :  { %s1810_s8 = smov [#allocation7]   ;;  %s1811_s16 = smov [#allocation10]  }
  0x9a   :  { %s71_s27 = sshll.u32 %s1810_s8, 4  ;;  %s101_s29 = sshll.u32 %s1811_s16, 4  ;;  %s72_s27 = int_to_ptr.vmem [resolvable:$true] %s71_s27  ;;  %s102_s29 = int_to_ptr.vmem [resolvable:$true] %s101_s29 }
  0x9b   :  { %s2322_s14 = sld [smem:[#allocation38_spill]] }
  0xa1   :  { %s1631_s5 = scalar_lea.hbm %s2322_s14, 1024 }
  0xa2   :  { %p1632_p0 = scmp.ne.s32.totalorder %s2322_s14, %s1631_s5  ;;  %p1635_p1 = scmp.lt.u32.totalorder %s1631_s5, %s2322_s14 }
  0xa4   :  { %p1637_p2 = pnand %p1635_p1, %p1632_p0 }
  0xa6   :  { %1640 = shalt.err (!%p1637_p2)
}
  0xa7   :  { %s1641_s26 = scalar_lea.vmem %s72_s27, 1024  ;;  %p1646_p4 = scmp.lt.s32.totalorder %s72_s27, %s72_s27 }
  0xa8   :  { %p1642_p3 = scmp.ne.s32.totalorder %s72_s27, %s1641_s26  ;;  %p1647_p5 = scmp.lt.s32.totalorder %s1641_s26, %s1641_s26 }
  0xaa   :  { %p1648_p6 = por %p1647_p5, %p1646_p4 }
  0xac   :  { %p1649_p7 = pnand %p1648_p6, %p1642_p3 }
  0xae   :  { %1652 = shalt.err (!%p1649_p7)
}
  0xaf   :  { %77 = dma.hbm_to_vmem [thread:$0]  %s2322_s14, 1024, %s72_s27, [#allocation6], %s1804_s7, %s1804_s7, %s1805_s28  }
  0xb0   :  { %s1653_s6 = scalar_lea.hbm %s2288_s11, 1024 }
  0xb1   :  { %p1654_p8 = scmp.ne.s32.totalorder %s2288_s11, %s1653_s6  ;;  %p1657_p9 = scmp.lt.u32.totalorder %s1653_s6, %s2288_s11 }
  0xb3   :  { %p1659_p10 = pnand %p1657_p9, %p1654_p8 }
  0xb5   :  { %1662 = shalt.err (!%p1659_p10)
}
  0xb6   :  { %s1663_s5 = scalar_lea.vmem %s102_s29, 1024  ;;  %p1668_p12 = scmp.lt.s32.totalorder %s102_s29, %s102_s29 }
  0xb7   :  { %p1664_p11 = scmp.ne.s32.totalorder %s102_s29, %s1663_s5  ;;  %p1669_p13 = scmp.lt.s32.totalorder %s1663_s5, %s1663_s5 }
  0xb9   :  { %p1670_p0 = por %p1669_p13, %p1668_p12 }
  0xbb   :  { %p1671_p1 = pnand %p1670_p0, %p1664_p11 }
  0xbd   :  { %1674 = shalt.err (!%p1671_p1)
}
  0xbe   :  { %107 = dma.hbm_to_vmem [thread:$0]  %s2288_s11, 1024, %s102_s29, [#allocation9], %s1804_s7, %s1804_s7, %s1805_s28  }
  0xbf   :  { %s1812_s0 = smov [#allocation13]   ;;  %s1813_s25 = smov [#allocation16]  }
  0xc0   :  { %s124_s9 = sshll.u32 %s1812_s0, 4  ;;  %s143_s30 = sshll.u32 %s1813_s25, 4  ;;  %s125_s9 = int_to_ptr.vmem [resolvable:$true] %s124_s9  ;;  %s144_s30 = int_to_ptr.vmem [resolvable:$true] %s143_s30 }
  0xc1   :  { %s1675_s3 = scalar_lea.hbm %s2290_s13, 16 }
  0xc2   :  { %p1676_p2 = scmp.ne.s32.totalorder %s2290_s13, %s1675_s3  ;;  %p1679_p3 = scmp.lt.u32.totalorder %s1675_s3, %s2290_s13 }
  0xc4   :  { %p1681_p4 = pnand %p1679_p3, %p1676_p2 }
  0xc6   :  { %1684 = shalt.err (!%p1681_p4)
}
  0xc7   :  { %s1685_s11 = scalar_lea.vmem %s125_s9, 16  ;;  %s1689_s29 = scalar_lea.vmem %s125_s9, 32 }
  0xc8   :  { %p1686_p5 = scmp.ne.s32.totalorder %s125_s9, %s1685_s11  ;;  %p1690_p6 = scmp.lt.s32.totalorder %s125_s9, %s125_s9 }
  0xc9   :  { %p1691_p7 = scmp.lt.s32.totalorder %s1689_s29, %s1685_s11 }
  0xcb   :  { %p1692_p8 = por %p1691_p7, %p1690_p6 }
  0xcd   :  { %p1693_p9 = pnand %p1692_p8, %p1686_p5 }
  0xcf   :  { %1696 = shalt.err (!%p1693_p9)
}
  0xd0   :  { %127 = dma.hbm_to_vmem [thread:$0]  %s2290_s13, 16, %s125_s9, [#allocation12]  }
  0xd1   :  { %s1697_s27 = scalar_lea.hbm %s2292_s15, 1024 }
  0xd2   :  { %p1698_p10 = scmp.ne.s32.totalorder %s2292_s15, %s1697_s27  ;;  %p1701_p11 = scmp.lt.u32.totalorder %s1697_s27, %s2292_s15 }
  0xd4   :  { %p1703_p12 = pnand %p1701_p11, %p1698_p10 }
  0xd6   :  { %1706 = shalt.err (!%p1703_p12)
}
  0xd7   :  { %s1707_s12 = scalar_lea.vmem %s144_s30, 1024  ;;  %p1712_p0 = scmp.lt.s32.totalorder %s144_s30, %s144_s30 }
  0xd8   :  { %p1708_p13 = scmp.ne.s32.totalorder %s144_s30, %s1707_s12  ;;  %p1713_p1 = scmp.lt.s32.totalorder %s1707_s12, %s1707_s12 }
  0xda   :  { %p1714_p2 = por %p1713_p1, %p1712_p0 }
  0xdc   :  { %p1715_p3 = pnand %p1714_p2, %p1708_p13 }
  0xde   :  { %1718 = shalt.err (!%p1715_p3)
}
  0xdf   :  { %149 = dma.hbm_to_vmem [thread:$0]  %s2292_s15, 1024, %s144_s30, [#allocation15], %s1804_s7, %s1804_s7, %s1805_s28  }
  0xe0   :  { %s1814_s3 = smov [#allocation19]   ;;  %s1815_s18 = smov [#allocation22]  }
  0xe1   :  { %s166_s1 = sshll.u32 %s1814_s3, 4  ;;  %s193_s6 = sshll.u32 %s1815_s18, 4  ;;  %s167_s1 = int_to_ptr.vmem [resolvable:$true] %s166_s1  ;;  %s194_s6 = int_to_ptr.vmem [resolvable:$true] %s193_s6 }
  0xe2   :  { %s1719_s29 = scalar_lea.hbm %s2294_s17, 16 }
  0xe3   :  { %p1720_p4 = scmp.ne.s32.totalorder %s2294_s17, %s1719_s29  ;;  %p1723_p5 = scmp.lt.u32.totalorder %s1719_s29, %s2294_s17 }
  0xe5   :  { %p1725_p6 = pnand %p1723_p5, %p1720_p4 }
  0xe7   :  { %1728 = shalt.err (!%p1725_p6)
}
  0xe8   :  { %s1729_s15 = scalar_lea.vmem %s167_s1, 16  ;;  %s1733_s30 = scalar_lea.vmem %s167_s1, 32 }
  0xe9   :  { %p1730_p7 = scmp.ne.s32.totalorder %s167_s1, %s1729_s15  ;;  %p1734_p8 = scmp.lt.s32.totalorder %s167_s1, %s167_s1 }
  0xea   :  { %p1735_p9 = scmp.lt.s32.totalorder %s1733_s30, %s1729_s15 }
  0xec   :  { %p1736_p10 = por %p1735_p9, %p1734_p8 }
  0xee   :  { %p1737_p11 = pnand %p1736_p10, %p1730_p7 }
  0xf0   :  { %1740 = shalt.err (!%p1737_p11)
}
  0xf1   :  { %169 = dma.hbm_to_vmem [thread:$0]  %s2294_s17, 16, %s167_s1, [#allocation18]  }
  0xf2   :  { %s1741_s26 = scalar_lea.hbm %s2300_s23, 1024 }
  0xf3   :  { %p1742_p12 = scmp.ne.s32.totalorder %s2300_s23, %s1741_s26  ;;  %p1745_p13 = scmp.lt.u32.totalorder %s1741_s26, %s2300_s23 }
  0xf5   :  { %p1747_p0 = pnand %p1745_p13, %p1742_p12 }
  0xf7   :  { %1750 = shalt.err (!%p1747_p0)
}
  0xf8   :  { %s1751_s18 = scalar_lea.vmem %s194_s6, 1024  ;;  %p1756_p2 = scmp.lt.s32.totalorder %s194_s6, %s194_s6 }
  0xf9   :  { %p1752_p1 = scmp.ne.s32.totalorder %s194_s6, %s1751_s18  ;;  %p1757_p3 = scmp.lt.s32.totalorder %s1751_s18, %s1751_s18 }
  0xfb   :  { %p1758_p4 = por %p1757_p3, %p1756_p2 }
  0xfd   :  { %p1759_p5 = pnand %p1758_p4, %p1752_p1 }
  0xff   :  { %1762 = shalt.err (!%p1759_p5)
}
 0x100   :  { %199 = dma.hbm_to_vmem [thread:$0]  %s2300_s23, 1024, %s194_s6, [#allocation21], %s1804_s7, %s1804_s7, %s1805_s28  }
 0x101   :  { %1785 = dma.done.wait [#allocation3], 128  }
 0x102   :  { %1786 = vsyncadd [#allocation3], 4294967168 }
 0x103   :  { %1787 = dma.done.wait [#allocation6], 1152  }
 0x104   :  { %1788 = vsyncadd [#allocation6], 4294966144 }
 0x105   :  { %1789 = dma.done.wait [#allocation9], 2048  }
 0x106   :  { %1790 = vsyncadd [#allocation9], 4294965248 }
 0x107   :  { %1791 = dma.done.wait [#allocation12], 32  }
 0x108   :  { %1792 = vsyncadd [#allocation12], 4294967264 }
 0x109   :  { %1793 = dma.done.wait [#allocation15], 1040  }
 0x10a   :  { %1794 = vsyncadd [#allocation15], 4294966256 }
 0x10b   :  { %1795 = dma.done.wait [#allocation18], 32  }
 0x10c   :  { %1796 = vsyncadd [#allocation18], 4294967264 }
 0x10d   :  { %1797 = dma.done.wait [#allocation21], 1040  }
 0x10e   :  { %1798 = vsyncadd [#allocation21], 4294966256  ;;  %v1816_v0 = vmov 0.0   ;;  %vm1817_vm0 = vmmov 0   ;;  %v1417_v1 = vld [vmem:[#allocation8] sm:$0xff]   ;;  %v1419_v3 = vld [vmem:[#allocation8 + $0x8] sm:$0xff]   ;;  %v270_v49 = vlaneseq }
 0x10f   :  { %1279 = vmatprep.subr.bf16.mxu0 %v1816_v0  ;;  %1299 = vmatprep.subr.bf16.mxu1 %v1816_v0  ;;  %v1418_v2 = vld [vmem:[#allocation7] sm:$0xff]   ;;  %v1420_v4 = vld [vmem:[#allocation7 + $0x8] sm:$0xff]   ;;  %v1421_v5 = vld [vmem:[#allocation8 + $0x10] sm:$0xff]   ;;  %s2323_s28 = sld [smem:[#allocation36_spill]]  ;;  %s2324_s11 = sld [smem:[#allocation34_spill]] }
 0x110   :  { %1295 = vmatprep.mubr.msk.bf16.mxu0 %vm1817_vm0, %v1816_v0  ;;  %1315 = vmatprep.mubr.msk.bf16.mxu1 %vm1817_vm0, %v1816_v0  ;;  %v1422_v6 = vld [vmem:[#allocation7 + $0x10] sm:$0xff]   ;;  %v1423_v7 = vld [vmem:[#allocation8 + $0x18] sm:$0xff]   ;;  %v1425_v9 = vld [vmem:[#allocation8 + $0x20] sm:$0xff]   ;;  %v271_v55 = vshrl.u32 %v270_v49, 7  ;;  %s2325_s4 = sld [smem:[#allocation37_spill]]  ;;  %s2326_s15 = sld [smem:[#allocation35_spill]] }
 0x111   :  { %1280 = vmatpush3.bf16.msra.mxu0 %v1417_v1  ;;  %1300 = vmatpush3.bf16.msra.mxu1 %v1418_v2  ;;  %v1424_v8 = vld [vmem:[#allocation7 + $0x18] sm:$0xff]   ;;  %v1426_v10 = vld [vmem:[#allocation7 + $0x20] sm:$0xff]   ;;  %v2139_v14 = vld [vmem:[#allocation2] sm:$0xff]  ;;  %s2327_s14 = sld [smem:[#allocation40_spill]]  ;;  %s2328_s26 = sld [smem:[#allocation41_spill]] }
 0x112   :  { %1281 = vmatprep.subr.bf16.mxu0 %v1816_v0  ;;  %1301 = vmatprep.subr.bf16.mxu1 %v1816_v0  ;;  %v2134_v11 = vld [vmem:[#allocation5] sm:$0xff]  ;;  %v1427_v15 = vld [vmem:[#allocation8 + $0x28] sm:$0xff]   ;;  %v246_v16 = vrot.slane %v2139_v14, 4  ;;  %v252_v17 = vmul.f32 %v2139_v14, %v2139_v14  ;;  %v1429_v25 = vld [vmem:[#allocation8 + $0x30] sm:$0xff]   ;;  %v2157_v60 = vsub.s32 0, %v271_v55 }
 0x113   :  { %v286_v12 = vrot.slane %v2134_v11, 4  ;;  %v292_v13 = vmul.f32 %v2134_v11, %v2134_v11  ;;  %v1428_v18 = vld [vmem:[#allocation7 + $0x28] sm:$0xff]   ;;  %v1430_v28 = vld [vmem:[#allocation7 + $0x30] sm:$0xff]   ;;  %v1431_v35 = vld [vmem:[#allocation8 + $0x38] sm:$0xff]  }
 0x114   :  { %v247_v21 = vadd.f32 %v246_v16, %v2139_v14  ;;  %v253_v22 = vrot.slane %v252_v17, 4  ;;  %v1432_v38 = vld [vmem:[#allocation7 + $0x38] sm:$0xff]  }
 0x115   :  { %1282 = vmatpush3.bf16.msra.mxu0 %v1419_v3  ;;  %1302 = vmatpush3.bf16.msra.mxu1 %v1420_v4  ;;  %v287_v19 = vadd.f32 %v286_v12, %v2134_v11  ;;  %v293_v20 = vrot.slane %v292_v13, 4  ;;  %v284_v59 = vld [vmem:[%s2323_s28] sm:$0x1] }
 0x116   :  { %1283 = vmatprep.subr.bf16.mxu0 %v1816_v0  ;;  %1303 = vmatprep.subr.bf16.mxu1 %v1816_v0  ;;  %v248_v26 = vrot.slane %v247_v21, 2  ;;  %v254_v27 = vadd.f32 %v253_v22, %v252_v17  ;;  %v244_v61 = vld [vmem:[%s2324_s11] sm:$0x1] }
 0x117   :  { %v288_v23 = vrot.slane %v287_v19, 2  ;;  %v294_v24 = vadd.f32 %v293_v20, %v292_v13  ;;  %v285_v2 = vld [vmem:[%s2325_s4] sm:$0x1] }
 0x118   :  { %v249_v31 = vadd.f32 %v248_v26, %v247_v21  ;;  %v255_v32 = vrot.slane %v254_v27, 2  ;;  %v1438_v26 = vld [vmem:[#allocation10 + $0x28] sm:$0xff]  }
 0x119   :  { %1284 = vmatpush3.bf16.msra.mxu0 %v1421_v5  ;;  %1304 = vmatpush3.bf16.msra.mxu1 %v1422_v6  ;;  %v289_v29 = vadd.f32 %v288_v23, %v287_v19  ;;  %v295_v30 = vrot.slane %v294_v24, 2  ;;  %v245_v6 = vld [vmem:[%s2326_s15] sm:$0x1] }
 0x11a   :  { %1285 = vmatprep.subr.bf16.mxu0 %v1816_v0  ;;  %1305 = vmatprep.subr.bf16.mxu1 %v1816_v0  ;;  %v250_v36 = vrot.slane %v249_v31, 1  ;;  %v256_v37 = vadd.f32 %v255_v32, %v254_v27  ;;  %v1435_v23 = vld [vmem:[#allocation10 + $0x10] sm:$0xff]  }
 0x11b   :  { %v290_v33 = vrot.slane %v289_v29, 1  ;;  %v296_v34 = vadd.f32 %v295_v30, %v294_v24  ;;  %v1436_v24 = vld [vmem:[#allocation10 + $0x18] sm:$0xff]   ;;  %v1439_v27 = vld [vmem:[#allocation10 + $0x30] sm:$0xff]  }
 0x11c   :  { %v251_v41 = vadd.f32 %v250_v36, %v249_v31  ;;  %v257_v42 = vrot.slane %v256_v37, 1  ;;  %v1188_v31 = vld [vmem:[%s2327_s14] ss:$0 sm:$0xff] }
 0x11d   :  { %1286 = vmatpush3.bf16.msra.mxu0 %v1423_v7  ;;  %1306 = vmatpush3.bf16.msra.mxu1 %v1424_v8  ;;  %v291_v39 = vadd.f32 %v290_v33, %v289_v29  ;;  %v297_v40 = vrot.slane %v296_v34, 1 }
 0x11e   :  { %1287 = vmatprep.subr.bf16.mxu0 %v1816_v0  ;;  %1307 = vmatprep.subr.bf16.mxu1 %v1816_v0  ;;  %v258_v45 = vadd.f32 %v257_v42, %v256_v37  ;;  %v259_v46 = vmul.f32 0.125, %v251_v41 }
 0x11f   :  { %v298_v43 = vadd.f32 %v297_v40, %v296_v34  ;;  %v299_v44 = vmul.f32 0.125, %v291_v39 }
 0x120   :  { %v260_v50 = vmul.f32 0.125, %v258_v45  ;;  %v261_v51 = vmul.f32 %v259_v46, %v259_v46 }
 0x121   :  { %1288 = vmatpush3.bf16.msra.mxu0 %v1425_v9  ;;  %1308 = vmatpush3.bf16.msra.mxu1 %v1426_v10  ;;  %v300_v47 = vmul.f32 0.125, %v298_v43  ;;  %v301_v48 = vmul.f32 %v299_v44, %v299_v44 }
 0x122   :  { %1289 = vmatprep.subr.bf16.mxu0 %v1816_v0  ;;  %1309 = vmatprep.subr.bf16.mxu1 %v1816_v0  ;;  %v262_v53 = vsub.f32 %v260_v50, %v261_v51 }
 0x123   :  { %v302_v52 = vsub.f32 %v300_v47, %v301_v48 }
 0x124   :  { %v263_v56 = vmax.f32 %v262_v53, 0.0 }
 0x125   :  { %1290 = vmatpush3.bf16.msra.mxu0 %v1427_v15  ;;  %1310 = vmatpush3.bf16.msra.mxu1 %v1428_v18  ;;  %v303_v54 = vmax.f32 %v302_v52, 0.0 }
 0x126   :  { %1291 = vmatprep.subr.bf16.mxu0 %v1816_v0  ;;  %1311 = vmatprep.subr.bf16.mxu1 %v1816_v0  ;;  %v264_v58 = vadd.f32 1e-05, %v263_v56 }
 0x127   :  { %v304_v57 = vadd.f32 1e-05, %v303_v54 }
 0x129   :  { %1292 = vmatpush3.bf16.msra.mxu0 %v1429_v25  ;;  %1312 = vmatpush3.bf16.msra.mxu1 %v1430_v28  ;;  %1465 = vrsqrt.f32 %v304_v57  ;;  %v1437_v25 = vld [vmem:[#allocation10 + $0x20] sm:$0xff]   ;;  %v1440_v28 = vld [vmem:[#allocation10 + $0x38] sm:$0xff]  }
 0x12a   :  { %1293 = vmatprep.subr.bf16.mxu0 %v1816_v0  ;;  %1313 = vmatprep.subr.bf16.mxu1 %v1816_v0  ;;  %1467 = vrsqrt.f32 %v264_v58 }
 0x12d   :  { %1294 = vmatpush3.bf16.msra.mxu0 %v1431_v35  ;;  %1314 = vmatpush3.bf16.msra.mxu1 %v1432_v38 }
 0x12e   :  { %1319 = vmatprep.subr.bf16.mxu0 %v1816_v0  ;;  %1339 = vmatprep.subr.bf16.mxu1 %v1816_v0 }
 0x133   :  { %v1466_v62 = vpop.eup %1465 }
 0x134   :  { %v1468_v63 = vpop.eup %1467  ;;  %v306_v1 = vmul.f32 %v1466_v62, %v284_v59  ;;  %v542_v59 = vld [vmem:[%s2328_s26] sm:$0x1] }
 0x135   :  { %v266_v3 = vmul.f32 %v1468_v63, %v244_v61  ;;  %v543_v63 = vld [vmem:[%s2287_s10] sm:$0x1] }
 0x136   :  { %v307_v4 = vmul.f32 %v306_v1, %v299_v44  ;;  %v313_v5 = vrot.slane %v306_v1, %v2157_v60 }
 0x137   :  { %v267_v7 = vmul.f32 %v266_v3, %v259_v46  ;;  %v273_v8 = vrot.slane %v266_v3, %v2157_v60 }
 0x138   :  { %v308_v9 = vsub.f32 %v285_v2, %v307_v4  ;;  %v315_v10 = vmul.f32 %v313_v5, %v2134_v11  ;;  %v1433_v11 = vld [vmem:[#allocation10] sm:$0xff]  }
 0x139   :  { %v268_v12 = vsub.f32 %v245_v6, %v267_v7  ;;  %v275_v13 = vmul.f32 %v273_v8, %v2139_v14  ;;  %v1434_v14 = vld [vmem:[#allocation10 + $0x8] sm:$0xff]  }
 0x13a   :  { %v320_v15 = vrot.slane %v308_v9, %v2157_v60  ;;  %v1441_v9 = vld [vmem:[#allocation16] sm:$0xff]  }
 0x13b   :  { %v280_v16 = vrot.slane %v268_v12, %v2157_v60  ;;  %v1443_v12 = vld [vmem:[#allocation16 + $0x10] sm:$0xff]  }
 0x13c   :  { %v322_v17 = vadd.f32 %v320_v15, %v315_v10  ;;  %v1442_v10 = vld [vmem:[#allocation16 + $0x8] sm:$0xff]   ;;  %v1445_v15 = vld [vmem:[#allocation16 + $0x20] sm:$0xff]  }
 0x13d   :  { %v282_v18 = vadd.f32 %v280_v16, %v275_v13  ;;  %v1444_v13 = vld [vmem:[#allocation16 + $0x18] sm:$0xff]   ;;  %v1446_v16 = vld [vmem:[#allocation16 + $0x28] sm:$0xff]  }
 0x13e   :  { %v323_v19 = vmax.f32 %v322_v17, 0.0  ;;  %v1447_v17 = vld [vmem:[#allocation16 + $0x30] sm:$0xff]  }
 0x13f   :  { %v283_v20 = vmax.f32 %v282_v18, 0.0  ;;  %v1448_v18 = vld [vmem:[#allocation16 + $0x38] sm:$0xff]  }
 0x140   :  { %v341_v21 = vpack.c.bf16 %v323_v19, %v323_v19  ;;  %v1189_v19 = vld [vmem:[#allocation11] ss:$0 sm:$0xff] }
 0x141   :  { %v324_v22 = vpack.c.bf16 %v283_v20, %v283_v20 }
 0x142   :  { %1296 = vmatmul.mubr.bf16.vlgmr.msra.gmra.mrb[0].mxu0 %v341_v21 }
 0x143   :  { %1316 = vmatmul.mubr.bf16.vlgmr.msra.gmra.mrb[0].mxu1 %v324_v22  ;;  %1335 = vmatprep.mubr.msk.bf16.mxu0 %vm1817_vm0, %v1816_v0 }
 0x144   :  { %1355 = vmatprep.mubr.msk.bf16.mxu1 %vm1817_vm0, %v1816_v0  ;;  %1320 = vmatpush3.bf16.msra.mxu0 %v1433_v11 }
 0x145   :  { %1321 = vmatprep.subr.bf16.mxu0 %v1816_v0  ;;  %1340 = vmatpush3.bf16.msra.mxu1 %v1441_v9 }
 0x146   :  { %1341 = vmatprep.subr.bf16.mxu1 %v1816_v0 }
 0x148   :  { %1322 = vmatpush3.bf16.msra.mxu0 %v1434_v14 }
 0x149   :  { %1323 = vmatprep.subr.bf16.mxu0 %v1816_v0  ;;  %1342 = vmatpush3.bf16.msra.mxu1 %v1442_v10 }
 0x14a   :  { %1343 = vmatprep.subr.bf16.mxu1 %v1816_v0 }
 0x14c   :  { %1324 = vmatpush3.bf16.msra.mxu0 %v1435_v23 }
 0x14d   :  { %1325 = vmatprep.subr.bf16.mxu0 %v1816_v0  ;;  %1344 = vmatpush3.bf16.msra.mxu1 %v1443_v12 }
 0x14e   :  { %1345 = vmatprep.subr.bf16.mxu1 %v1816_v0 }
 0x150   :  { %1326 = vmatpush3.bf16.msra.mxu0 %v1436_v24 }
 0x151   :  { %1327 = vmatprep.subr.bf16.mxu0 %v1816_v0  ;;  %1346 = vmatpush3.bf16.msra.mxu1 %v1444_v13 }
 0x152   :  { %1347 = vmatprep.subr.bf16.mxu1 %v1816_v0 }
 0x154   :  { %1328 = vmatpush3.bf16.msra.mxu0 %v1437_v25 }
 0x155   :  { %1329 = vmatprep.subr.bf16.mxu0 %v1816_v0  ;;  %1348 = vmatpush3.bf16.msra.mxu1 %v1445_v15 }
 0x156   :  { %1349 = vmatprep.subr.bf16.mxu1 %v1816_v0 }
 0x158   :  { %1330 = vmatpush3.bf16.msra.mxu0 %v1438_v26 }
 0x159   :  { %1331 = vmatprep.subr.bf16.mxu0 %v1816_v0  ;;  %1350 = vmatpush3.bf16.msra.mxu1 %v1446_v16 }
 0x15a   :  { %1351 = vmatprep.subr.bf16.mxu1 %v1816_v0 }
 0x15c   :  { %1332 = vmatpush3.bf16.msra.mxu0 %v1439_v27 }
 0x15d   :  { %1333 = vmatprep.subr.bf16.mxu0 %v1816_v0  ;;  %1352 = vmatpush3.bf16.msra.mxu1 %v1447_v17 }
 0x15e   :  { %1353 = vmatprep.subr.bf16.mxu1 %v1816_v0 }
 0x160   :  { %1334 = vmatpush3.bf16.msra.mxu0 %v1440_v28 }
 0x161   :  { %1359 = vmatprep.subr.bf16.mxu0 %v1816_v0  ;;  %1354 = vmatpush3.bf16.msra.mxu1 %v1448_v18 }
 0x162   :  { %1379 = vmatprep.subr.bf16.mxu1 %v1816_v0 }
 0x215   :  { %v440_v29 = vpop.f32.mrb[0].mxu0 }
 0x216   :  { %v528_v30 = vpop.f32.mrb[0].mxu1  ;;  %v1297_v32 = vpop.f32.mrb[1].mxu0 }
 0x217   :  { %v529_v33 = vadd.f32 %v528_v30, %v440_v29  ;;  %v1317_v34 = vpop.f32.mrb[1].mxu1  ;;  %v443_v35 = vpop.f32.mrb[2].mxu0 }
 0x218   :  { %v531_v36 = vpop.f32.mrb[2].mxu1  ;;  %v1298_v37 = vpop.f32.mrb[3].mxu0 }
 0x219   :  { %v541_v38 = vadd.f32 %v1188_v31, %v529_v33  ;;  %v1318_v39 = vpop.f32.mrb[3].mxu1 }
 0x21b   :  { %v544_v40 = vrot.slane %v541_v38, 4  ;;  %v550_v41 = vmul.f32 %v541_v38, %v541_v38 }
 0x21d   :  { %v545_v42 = vadd.f32 %v544_v40, %v541_v38  ;;  %v551_v43 = vrot.slane %v550_v41, 4 }
 0x21f   :  { %v546_v44 = vrot.slane %v545_v42, 2  ;;  %v552_v45 = vadd.f32 %v551_v43, %v550_v41 }
 0x221   :  { %v547_v46 = vadd.f32 %v546_v44, %v545_v42  ;;  %v553_v47 = vrot.slane %v552_v45, 2  ;;  %v694_v42 = vld [vmem:[#allocation13] sm:$0x1] }
 0x223   :  { %v548_v48 = vrot.slane %v547_v46, 1  ;;  %v554_v49 = vadd.f32 %v553_v47, %v552_v45  ;;  %v695_v45 = vld [vmem:[#allocation14] sm:$0x1] }
 0x225   :  { %v549_v50 = vadd.f32 %v548_v48, %v547_v46  ;;  %v555_v51 = vrot.slane %v554_v49, 1 }
 0x227   :  { %v556_v52 = vadd.f32 %v555_v51, %v554_v49  ;;  %v557_v53 = vmul.f32 0.125, %v549_v50 }
 0x229   :  { %v558_v54 = vmul.f32 0.125, %v556_v52  ;;  %v559_v55 = vmul.f32 %v557_v53, %v557_v53 }
 0x22b   :  { %v560_v56 = vsub.f32 %v558_v54, %v559_v55  ;;  %v1449_v54 = vld [vmem:[%s2296_s19] sm:$0xff]   ;;  %v1450_v55 = vld [vmem:[%s2296_s19 + $0x8] sm:$0xff]  }
 0x22d   :  { %v561_v57 = vmax.f32 %v560_v56, 0.0  ;;  %v1451_v56 = vld [vmem:[%s2296_s19 + $0x10] sm:$0xff]  }
 0x22f   :  { %v562_v58 = vadd.f32 1e-05, %v561_v57  ;;  %v1452_v57 = vld [vmem:[%s2296_s19 + $0x18] sm:$0xff]  }
 0x231   :  { %1469 = vrsqrt.f32 %v562_v58  ;;  %v1453_v58 = vld [vmem:[%s2296_s19 + $0x20] sm:$0xff]  }
 0x23b   :  { %v1470_v61 = vpop.eup %1469 }
 0x23c   :  { %v564_v62 = vmul.f32 %v1470_v61, %v542_v59  ;;  %v1454_v59 = vld [vmem:[%s2296_s19 + $0x28] sm:$0xff]   ;;  %v1455_v61 = vld [vmem:[%s2296_s19 + $0x30] sm:$0xff]  }
 0x23e   :  { %v565_v1 = vmul.f32 %v564_v62, %v557_v53  ;;  %v571_v2 = vrot.slane %v564_v62, %v2157_v60  ;;  %v1456_v62 = vld [vmem:[%s2296_s19 + $0x38] sm:$0xff]  }
 0x240   :  { %v566_v3 = vsub.f32 %v543_v63, %v565_v1  ;;  %v573_v4 = vmul.f32 %v571_v2, %v541_v38  ;;  %v1198_v63 = vld [vmem:[#allocation17] ss:$0 sm:$0xff] }
 0x242   :  { %v578_v5 = vrot.slane %v566_v3, %v2157_v60 }
 0x244   :  { %v580_v6 = vadd.f32 %v578_v5, %v573_v4 }
 0x246   :  { %v581_v7 = vmax.f32 %v580_v6, 0.0 }
 0x248   :  { %v583_v8 = vpack.c.bf16 %v581_v7, %v581_v7 }
 0x24a   :  { %1336 = vmatmul.mubr.bf16.vlgmr.msra.gmra.mrb[4].mxu0 %v583_v8 }
 0x24b   :  { %1375 = vmatprep.mubr.msk.bf16.mxu0 %vm1817_vm0, %v1816_v0  ;;  %1360 = vmatpush3.bf16.msra.mxu0 %v1449_v54 }
 0x24c   :  { %1361 = vmatprep.subr.bf16.mxu0 %v1816_v0 }
 0x24f   :  { %1362 = vmatpush3.bf16.msra.mxu0 %v1450_v55 }
 0x250   :  { %1363 = vmatprep.subr.bf16.mxu0 %v1816_v0 }
 0x253   :  { %1364 = vmatpush3.bf16.msra.mxu0 %v1451_v56 }
 0x254   :  { %1365 = vmatprep.subr.bf16.mxu0 %v1816_v0 }
 0x257   :  { %1366 = vmatpush3.bf16.msra.mxu0 %v1452_v57 }
 0x258   :  { %1367 = vmatprep.subr.bf16.mxu0 %v1816_v0 }
 0x25b   :  { %1368 = vmatpush3.bf16.msra.mxu0 %v1453_v58 }
 0x25c   :  { %1369 = vmatprep.subr.bf16.mxu0 %v1816_v0 }
 0x25f   :  { %1370 = vmatpush3.bf16.msra.mxu0 %v1454_v59 }
 0x260   :  { %1371 = vmatprep.subr.bf16.mxu0 %v1816_v0 }
 0x263   :  { %1372 = vmatpush3.bf16.msra.mxu0 %v1455_v61 }
 0x264   :  { %1373 = vmatprep.subr.bf16.mxu0 %v1816_v0 }
 0x267   :  { %1374 = vmatpush3.bf16.msra.mxu0 %v1456_v62 }
 0x31d   :  { %v688_v20 = vpop.f32.mrb[4].mxu0 }
 0x31e   :  { %v689_v21 = vadd.f32 %v1189_v19, %v688_v20  ;;  %v1337_v22 = vpop.f32.mrb[5].mxu0 }
 0x31f   :  { %v691_v11 = vpop.f32.mrb[6].mxu0 }
 0x320   :  { %v696_v14 = vrot.slane %v689_v21, 4  ;;  %v702_v23 = vmul.f32 %v689_v21, %v689_v21  ;;  %v1338_v24 = vpop.f32.mrb[7].mxu0 }
 0x322   :  { %v697_v25 = vadd.f32 %v696_v14, %v689_v21  ;;  %v703_v26 = vrot.slane %v702_v23, 4 }
 0x324   :  { %v698_v27 = vrot.slane %v697_v25, 2  ;;  %v704_v28 = vadd.f32 %v703_v26, %v702_v23 }
 0x326   :  { %v699_v29 = vadd.f32 %v698_v27, %v697_v25  ;;  %v705_v30 = vrot.slane %v704_v28, 2  ;;  %v846_v25 = vld [vmem:[#allocation19] sm:$0x1] }
 0x328   :  { %v700_v31 = vrot.slane %v699_v29, 1  ;;  %v706_v32 = vadd.f32 %v705_v30, %v704_v28  ;;  %v847_v28 = vld [vmem:[#allocation20] sm:$0x1] }
 0x32a   :  { %v701_v33 = vadd.f32 %v700_v31, %v699_v29  ;;  %v707_v34 = vrot.slane %v706_v32, 1 }
 0x32c   :  { %v708_v35 = vadd.f32 %v707_v34, %v706_v32  ;;  %v709_v36 = vmul.f32 0.125, %v701_v33 }
 0x32e   :  { %v710_v37 = vmul.f32 0.125, %v708_v35  ;;  %v711_v38 = vmul.f32 %v709_v36, %v709_v36 }
 0x330   :  { %v712_v39 = vsub.f32 %v710_v37, %v711_v38  ;;  %v1457_v37 = vld [vmem:[#allocation22] sm:$0xff]   ;;  %v1458_v38 = vld [vmem:[#allocation22 + $0x8] sm:$0xff]  }
 0x332   :  { %v713_v40 = vmax.f32 %v712_v39, 0.0  ;;  %v1459_v39 = vld [vmem:[#allocation22 + $0x10] sm:$0xff]  }
 0x334   :  { %v714_v41 = vadd.f32 1e-05, %v713_v40  ;;  %v1460_v40 = vld [vmem:[#allocation22 + $0x18] sm:$0xff]  }
 0x336   :  { %1471 = vrsqrt.f32 %v714_v41  ;;  %v1461_v41 = vld [vmem:[#allocation22 + $0x20] sm:$0xff]  }
 0x340   :  { %v1472_v43 = vpop.eup %1471 }
 0x341   :  { %v716_v44 = vmul.f32 %v1472_v43, %v694_v42  ;;  %v1462_v42 = vld [vmem:[#allocation22 + $0x28] sm:$0xff]   ;;  %v1463_v43 = vld [vmem:[#allocation22 + $0x30] sm:$0xff]  }
 0x343   :  { %v723_v46 = vrot.slane %v716_v44, %v2157_v60  ;;  %v717_v47 = vmul.f32 %v716_v44, %v709_v36  ;;  %v1464_v44 = vld [vmem:[#allocation22 + $0x38] sm:$0xff]  }
 0x345   :  { %v718_v48 = vsub.f32 %v695_v45, %v717_v47  ;;  %v725_v49 = vmul.f32 %v723_v46, %v689_v21  ;;  %v1207_v45 = vld [vmem:[%s2297_s20] ss:$0 sm:$0xff] }
 0x347   :  { %v730_v50 = vrot.slane %v718_v48, %v2157_v60 }
 0x349   :  { %v732_v51 = vadd.f32 %v730_v50, %v725_v49 }
 0x34b   :  { %v733_v52 = vmax.f32 %v732_v51, 0.0 }
 0x34d   :  { %v735_v53 = vpack.c.bf16 %v733_v52, %v733_v52 }
 0x34f   :  { %1356 = vmatmul.mubr.bf16.vlgmr.msra.gmra.mrb[4].mxu1 %v735_v53 }
 0x350   :  { %1395 = vmatprep.mubr.msk.bf16.mxu1 %vm1817_vm0, %v1816_v0  ;;  %1380 = vmatpush3.bf16.msra.mxu1 %v1457_v37 }
 0x351   :  { %1381 = vmatprep.subr.bf16.mxu1 %v1816_v0 }
 0x354   :  { %1382 = vmatpush3.bf16.msra.mxu1 %v1458_v38 }
 0x355   :  { %1383 = vmatprep.subr.bf16.mxu1 %v1816_v0 }
 0x358   :  { %1384 = vmatpush3.bf16.msra.mxu1 %v1459_v39 }
 0x359   :  { %1385 = vmatprep.subr.bf16.mxu1 %v1816_v0 }
 0x35c   :  { %1386 = vmatpush3.bf16.msra.mxu1 %v1460_v40 }
 0x35d   :  { %1387 = vmatprep.subr.bf16.mxu1 %v1816_v0 }
 0x360   :  { %1388 = vmatpush3.bf16.msra.mxu1 %v1461_v41 }
 0x361   :  { %1389 = vmatprep.subr.bf16.mxu1 %v1816_v0 }
 0x364   :  { %1390 = vmatpush3.bf16.msra.mxu1 %v1462_v42 }
 0x365   :  { %1391 = vmatprep.subr.bf16.mxu1 %v1816_v0 }
 0x368   :  { %1392 = vmatpush3.bf16.msra.mxu1 %v1463_v43 }
 0x369   :  { %1393 = vmatprep.subr.bf16.mxu1 %v1816_v0 }
 0x36c   :  { %1394 = vmatpush3.bf16.msra.mxu1 %v1464_v44 }
 0x422   :  { %v840_v1 = vpop.f32.mrb[4].mxu1 }
 0x423   :  { %v841_v2 = vadd.f32 %v1198_v63, %v840_v1  ;;  %v1357_v3 = vpop.f32.mrb[5].mxu1 }
 0x424   :  { %v843_v4 = vpop.f32.mrb[6].mxu1 }
 0x425   :  { %v848_v5 = vrot.slane %v841_v2, 4  ;;  %v854_v6 = vmul.f32 %v841_v2, %v841_v2  ;;  %v1358_v7 = vpop.f32.mrb[7].mxu1 }
 0x426   :  { %v998_v7 = vld [vmem:[%s2298_s21] sm:$0x1]  ;;  %s1818_s21 = smov [#allocation23]  }
 0x427   :  { %v849_v8 = vadd.f32 %v848_v5, %v841_v2  ;;  %v855_v9 = vrot.slane %v854_v6, 4  ;;  %s1157_s25 = sshll.u32 %s1818_s21, 4  ;;  %s1158_s25 = int_to_ptr.vmem [resolvable:$true] %s1157_s25 }
 0x428   :  { %p1768_p7 = scmp.lt.s32.totalorder %s1158_s25, %s1158_s25 }
 0x429   :  { %v850_v10 = vrot.slane %v849_v8, 2  ;;  %v856_v12 = vadd.f32 %v855_v9, %v854_v6 }
 0x42b   :  { %v851_v13 = vadd.f32 %v850_v10, %v849_v8  ;;  %v857_v15 = vrot.slane %v856_v12, 2  ;;  %v999_v10 = vld [vmem:[%s2299_s22] sm:$0x1]  ;;  %s1763_s22 = scalar_lea.vmem %s1158_s25, 128 }
 0x42c   :  { %p1764_p6 = scmp.ne.s32.totalorder %s1158_s25, %s1763_s22  ;;  %p1769_p8 = scmp.lt.s32.totalorder %s1763_s22, %s1763_s22 }
 0x42d   :  { %v852_v16 = vrot.slane %v851_v13, 1  ;;  %v858_v17 = vadd.f32 %v857_v15, %v856_v12 }
 0x42e   :  { %p1770_p9 = por %p1769_p8, %p1768_p7 }
 0x42f   :  { %v853_v18 = vadd.f32 %v852_v16, %v851_v13  ;;  %v859_v19 = vrot.slane %v858_v17, 1 }
 0x430   :  { %p1771_p10 = pnand %p1770_p9, %p1764_p6 }
 0x431   :  { %v860_v20 = vadd.f32 %v859_v19, %v858_v17  ;;  %v861_v21 = vmul.f32 0.125, %v853_v18 }
 0x433   :  { %v862_v22 = vmul.f32 0.125, %v860_v20  ;;  %v863_v11 = vmul.f32 %v861_v21, %v861_v21 }
 0x435   :  { %v864_v14 = vsub.f32 %v862_v22, %v863_v11 }
 0x437   :  { %v865_v23 = vmax.f32 %v864_v14, 0.0 }
 0x439   :  { %v866_v24 = vadd.f32 1e-05, %v865_v23 }
 0x43b   :  { %1473 = vrsqrt.f32 %v866_v24 }
 0x445   :  { %v1474_v26 = vpop.eup %1473 }
 0x446   :  { %v868_v27 = vmul.f32 %v1474_v26, %v846_v25 }
 0x448   :  { %v875_v29 = vrot.slane %v868_v27, %v2157_v60  ;;  %v869_v30 = vmul.f32 %v868_v27, %v861_v21  ;;  %v1216_v21 = vld [vmem:[%s2301_s24] ss:$0 sm:$0xff] }
 0x44a   :  { %v870_v31 = vsub.f32 %v847_v28, %v869_v30  ;;  %v877_v32 = vmul.f32 %v875_v29, %v841_v2 }
 0x44c   :  { %v882_v33 = vrot.slane %v870_v31, %v2157_v60 }
 0x44e   :  { %v884_v34 = vadd.f32 %v882_v33, %v877_v32 }
 0x450   :  { %v885_v35 = vmax.f32 %v884_v34, 0.0 }
 0x452   :  { %v887_v36 = vpack.c.bf16 %v885_v35, %v885_v35 }
 0x454   :  { %1376 = vmatmul.mubr.bf16.vlgmr.msra.gmra.mrb[8].mxu0 %v887_v36 }
 0x527   :  { %v992_v46 = vpop.f32.mrb[8].mxu0 }
 0x528   :  { %v993_v47 = vadd.f32 %v1207_v45, %v992_v46  ;;  %v1377_v48 = vpop.f32.mrb[9].mxu0 }
 0x529   :  { %v995_v49 = vpop.f32.mrb[10].mxu0 }
 0x52a   :  { %v1000_v50 = vrot.slane %v993_v47, 4  ;;  %v1006_v51 = vmul.f32 %v993_v47, %v993_v47  ;;  %v1378_v52 = vpop.f32.mrb[11].mxu0 }
 0x52c   :  { %v1001_v53 = vadd.f32 %v1000_v50, %v993_v47  ;;  %v1007_v54 = vrot.slane %v1006_v51, 4 }
 0x52e   :  { %v1002_v55 = vrot.slane %v1001_v53, 2  ;;  %v1008_v56 = vadd.f32 %v1007_v54, %v1006_v51 }
 0x530   :  { %v1003_v57 = vadd.f32 %v1002_v55, %v1001_v53  ;;  %v1009_v58 = vrot.slane %v1008_v56, 2 }
 0x532   :  { %v1004_v59 = vrot.slane %v1003_v57, 1  ;;  %v1010_v0 = vadd.f32 %v1009_v58, %v1008_v56 }
 0x534   :  { %v1005_v61 = vadd.f32 %v1004_v59, %v1003_v57  ;;  %v1011_v62 = vrot.slane %v1010_v0, 1 }
 0x536   :  { %v1012_v63 = vadd.f32 %v1011_v62, %v1010_v0  ;;  %v1013_v1 = vmul.f32 0.125, %v1005_v61 }
 0x538   :  { %v1014_v2 = vmul.f32 0.125, %v1012_v63  ;;  %v1015_v3 = vmul.f32 %v1013_v1, %v1013_v1 }
 0x53a   :  { %v1016_v4 = vsub.f32 %v1014_v2, %v1015_v3 }
 0x53c   :  { %v1017_v5 = vmax.f32 %v1016_v4, 0.0 }
 0x53e   :  { %v1018_v6 = vadd.f32 1e-05, %v1017_v5 }
 0x540   :  { %1475 = vrsqrt.f32 %v1018_v6 }
 0x54a   :  { %v1476_v8 = vpop.eup %1475 }
 0x54b   :  { %v1020_v9 = vmul.f32 %v1476_v8, %v998_v7 }
 0x54d   :  { %v1027_v12 = vrot.slane %v1020_v9, %v2157_v60  ;;  %v1021_v13 = vmul.f32 %v1020_v9, %v1013_v1 }
 0x54f   :  { %v1022_v15 = vsub.f32 %v999_v10, %v1021_v13  ;;  %v1029_v16 = vmul.f32 %v1027_v12, %v993_v47 }
 0x551   :  { %v1034_v17 = vrot.slane %v1022_v15, %v2157_v60 }
 0x553   :  { %v1036_v18 = vadd.f32 %v1034_v17, %v1029_v16 }
 0x555   :  { %v1037_v19 = vmax.f32 %v1036_v18, 0.0 }
 0x557   :  { %v1039_v20 = vpack.c.bf16 %v1037_v19, %v1037_v19 }
 0x559   :  { %1396 = vmatmul.mubr.bf16.vlgmr.msra.gmra.mrb[8].mxu1 %v1039_v20 }
 0x62c   :  { %v1144_v22 = vpop.f32.mrb[8].mxu1 }
 0x62d   :  { %v1145_v11 = vadd.f32 %v1216_v21, %v1144_v22  ;;  %v1397_v14 = vpop.f32.mrb[9].mxu1 }
 0x62e   :  { %v1147_v23 = vpop.f32.mrb[10].mxu1 }
 0x62f   :  { %1150 = vst [vmem:[#allocation23] sm:$0xff] %v1145_v11  ;;  %v1398_v24 = vpop.f32.mrb[11].mxu1 }
 0x630   :  { %1774 = shalt.err (!%p1771_p10)
}
 0x631   :  { %s2329_s13 = sld [smem:[#allocation42_spill]] }
 0x637   :  { %s1775_s24 = scalar_lea.hbm %s2329_s13, 128 }
 0x638   :  { %p1776_p11 = scmp.ne.s32.totalorder %s2329_s13, %s1775_s24  ;;  %p1779_p12 = scmp.lt.u32.totalorder %s1775_s24, %s2329_s13 }
 0x63a   :  { %p1781_p13 = pnand %p1779_p12, %p1776_p11 }
 0x63c   :  { %1784 = shalt.err (!%p1781_p13)
}
 0x63d   :  { %1160 = dma.vmem_to_hbm [thread:$0]  %s1158_s25, 128, %s2329_s13, [#allocation4]  }
 0x63e   :  { %1799 = dma.done.wait [#allocation4], 128  }
 0x63f   :  { %1800 = vsyncadd [#allocation4], 4294967168 }
 0x640   :  { %1164 = vsyncpa [#allocation3], 1 }
 0x641   :  { %1165 = vsyncpa [#allocation6], 1 }
 0x642   :  { %1166 = vsyncpa [#allocation9], 1 }
 0x643   :  { %1167 = vsyncpa [#allocation12], 1 }
 0x644   :  { %1168 = vsyncpa [#allocation15], 1 }
 0x645   :  { %1169 = vsyncpa [#allocation18], 1 }
 0x646   :  { %1170 = vsyncpa [#allocation21], 1 }
 0x647   :  { %1171 = vsyncpa [#allocation4], 1 }

</bundles_post_ra>
